<compile_context>
chip_gen: v7x
topology: tpu7x:2x2x1
jax: 0.10.0
libtpu: 0.0.40
codegen_flags: <defaults>
</compile_context>

<pallas_src>
import functools
import math

import jax
import jax.numpy as jnp
from jax.experimental import pallas as pl
from jax.experimental.pallas import tpu as pltpu


def _round_up(x, m):
    return (x + m - 1) // m * m


def head_transform_kernel(x_ref, w_ref, b_ref, gamma_ref, beta_ref, o_ref,
                          *, eps, inv_h):
    # x_ref:     (TM, H) input row tile (bf16 or f32)
    # w_ref:     (H, H)  dense weight in PyTorch [out, in] layout (bf16 or f32)
    # b_ref:     (1, H)  dense bias (f32)
    # gamma_ref: (1, H)  LayerNorm weight (f32)
    # beta_ref:  (1, H)  LayerNorm bias (f32)
    x = x_ref[...]
    w = w_ref[...]

    # Dense: y = x @ W^T + b. Contract dim 1 of x with dim 1 of w so the
    # weight never needs a transposed HBM copy; accumulate in f32 on the MXU.
    y = jax.lax.dot_general(
        x, w,
        dimension_numbers=(((1,), (1,)), ((), ())),
        preferred_element_type=jnp.float32,
    )
    y = y + b_ref[...]

    # Exact erf-based GELU: y * 0.5 * (1 + erf(y / sqrt(2)))
    y = y * 0.5 * (1.0 + jax.lax.erf(y * (1.0 / math.sqrt(2.0))))

    # LayerNorm over last dim, fused stats: var = E[y^2] - mean^2 (biased).
    s1 = jnp.sum(y, axis=-1, keepdims=True)
    s2 = jnp.sum(y * y, axis=-1, keepdims=True)
    mean = s1 * inv_h
    var = jnp.maximum(s2 * inv_h - mean * mean, 0.0)
    inv = jax.lax.rsqrt(var + eps)
    o_ref[...] = ((y - mean) * inv * gamma_ref[...] + beta_ref[...]).astype(o_ref.dtype)


def _build_in_specs(tm, H, single_buffer_invariants):
    # Weight / bias / LN params have a constant index_map (grid-invariant);
    # single-buffering them saves the second VMEM buffer (H*H*dtype for W).
    kw = dict(pipeline_mode=pl.Buffered(1)) if single_buffer_invariants else {}
    return [
        pl.BlockSpec((tm, H), lambda i: (i, 0)),          # x row tile
        pl.BlockSpec((H, H), lambda i: (0, 0), **kw),     # W (resident, [out, in])
        pl.BlockSpec((1, H), lambda i: (0, 0), **kw),     # dense bias
        pl.BlockSpec((1, H), lambda i: (0, 0), **kw),     # LN weight
        pl.BlockSpec((1, H), lambda i: (0, 0), **kw),     # LN bias
    ]


def visual_prediction_head_transform(x, weight, bias, ln_weight, ln_bias,
                                     layer_norm_eps=1e-12, tm=256,
                                     compute_dtype=jnp.bfloat16):
    """x: [B, S, H]; weight: [H, H] PyTorch Linear weight (y = x @ W.T + b)."""
    B, S, H = x.shape
    N = B * S

    # Row tile: keep it a sublane multiple (16 works for both f32 and bf16)
    # and never larger than the (padded) number of rows.
    tm = max(16, min(_round_up(tm, 16), _round_up(N, 16)))

    # MXU operands in compute_dtype (bf16 by default); epilogue stays f32.
    # In a real model, cast the weight to bf16 once at load time, not per call.
    x2 = x.reshape(N, H).astype(compute_dtype)
    w = weight.astype(compute_dtype)
    b2 = bias.reshape(1, H).astype(jnp.float32)
    g2 = ln_weight.reshape(1, H).astype(jnp.float32)
    be2 = ln_bias.reshape(1, H).astype(jnp.float32)

    out_dtype = x.dtype
    in_bytes = jnp.dtype(compute_dtype).itemsize
    out_bytes = jnp.dtype(out_dtype).itemsize
    # VMEM estimate: single-buffered weight + double-buffered x/out tiles.
    est = (H * H * in_bytes + 2 * tm * H * in_bytes + 2 * tm * H * out_bytes
           + 6 * H * 4)
    # Headroom for f32 intermediates; cap below v7x's 64 MiB physical VMEM.
    vmem_limit = int(min(max(4 * est, 32 * 1024 * 1024), 56 * 1024 * 1024))

    kernel = functools.partial(head_transform_kernel,
                               eps=float(layer_norm_eps), inv_h=1.0 / H)
    grid = (pl.cdiv(N, tm),)

    def _call(single_buffer_invariants):
        return pl.pallas_call(
            kernel,
            out_shape=jax.ShapeDtypeStruct((N, H), out_dtype),
            grid_spec=pltpu.PrefetchScalarGridSpec(
                num_scalar_prefetch=0,
                grid=grid,
                in_specs=_build_in_specs(tm, H, single_buffer_invariants),
                out_specs=pl.BlockSpec((tm, H), lambda i: (i, 0)),
            ),
            compiler_params=pltpu.CompilerParams(
                # Parallel row axis: shards across the 2 TensorCores on v7x,
                # no-op on v5e/v6e.
                dimension_semantics=("parallel",),
                vmem_limit_bytes=vmem_limit),
        )(x2, w, b2, g2, be2)

    try:
        out = _call(True)
    except Exception:
        # Fallback if this JAX build rejects Buffered(1) (single-buffer) specs.
        out = _call(False)

    return out.reshape(B, S, H)


def _reference(x, weight, bias, ln_weight, ln_bias, eps=1e-12):
    y = jnp.einsum("bsh,oh->bso", x, weight,
                   precision=jax.lax.Precision.HIGHEST) + bias
    y = y * 0.5 * (1.0 + jax.lax.erf(y / math.sqrt(2.0)))
    mean = jnp.mean(y, axis=-1, keepdims=True)
    var = jnp.mean((y - mean) ** 2, axis=-1, keepdims=True)
    return (y - mean) * jax.lax.rsqrt(var + eps) * ln_weight + ln_bias


if __name__ == "__main__":
    # Small synthetic config; H is a lane-dense multiple of 128.
    B, S, H = 2, 8, 128
    eps = 1e-12

    key = jax.random.PRNGKey(0)
    kx, kw, kb, kg, kbe = jax.random.split(key, 5)

    x = jax.random.normal(kx, (B, S, H), dtype=jnp.float32)
    # Deterministic parameter init (synthetic; not loaded from a checkpoint)
    weight = jax.random.normal(kw, (H, H), dtype=jnp.float32) * 0.02  # Linear weight [out, in]
    bias = jax.random.normal(kb, (H,), dtype=jnp.float32) * 0.01
    ln_weight = jnp.ones((H,), dtype=jnp.float32) + 0.1 * jax.random.normal(kg, (H,), dtype=jnp.float32)
    ln_bias = 0.1 * jax.random.normal(kbe, (H,), dtype=jnp.float32)

    ref = _reference(x, weight, bias, ln_weight, ln_bias, eps)

    # f32 MXU path: tight tolerance vs. the f32 reference.
    out_f32 = visual_prediction_head_transform(
        x, weight, bias, ln_weight, ln_bias, eps, compute_dtype=jnp.float32)
    out_f32 = jax.block_until_ready(out_f32)
    assert out_f32.shape == (B, S, H)
    assert bool(jnp.allclose(out_f32, ref, atol=2e-3, rtol=2e-3)), "f32 mismatch vs reference"

    # bf16 MXU path (production default): looser tolerance for bf16 operands.
    out_bf16 = visual_prediction_head_transform(
        x, weight, bias, ln_weight, ln_bias, eps, compute_dtype=jnp.bfloat16)
    out_bf16 = jax.block_until_ready(out_bf16)
    assert out_bf16.shape == (B, S, H)
    assert bool(jnp.allclose(out_bf16, ref, atol=6e-2, rtol=6e-2)), "bf16 mismatch vs reference"

    print("KERNEL_OK")
</pallas_src>

<mosaic_0001>
module attributes {stable_mosaic.version = 11 : i64} {
  func.func @head_transform_kernel(%arg0: i32, %arg1: memref<16x128xf32, #tpu.memory_space<vmem>>, %arg2: memref<128x128xf32, #tpu.memory_space<vmem>>, %arg3: memref<1x128xf32, #tpu.memory_space<vmem>>, %arg4: memref<1x128xf32, #tpu.memory_space<vmem>>, %arg5: memref<1x128xf32, #tpu.memory_space<vmem>>, %arg6: memref<16x128xf32, #tpu.memory_space<vmem>>) attributes {dimension_semantics = [#tpu.dimension_semantics<parallel>], iteration_bounds = array<i64: 1>, scalar_prefetch = 0 : i64, scratch_operands = 0 : i64, tpu.core_type = #tpu.core_type<tc>, window_params = [{transform_indices = @transform_0, window_bounds = array<i64: 16, 128>}, {pipeline_mode = #tpu.pipeline_mode<synchronous>, transform_indices = @transform_1, window_bounds = array<i64: 128, 128>}, {pipeline_mode = #tpu.pipeline_mode<synchronous>, transform_indices = @transform_2, window_bounds = array<i64: 1, 128>}, {pipeline_mode = #tpu.pipeline_mode<synchronous>, transform_indices = @transform_3, window_bounds = array<i64: 1, 128>}, {pipeline_mode = #tpu.pipeline_mode<synchronous>, transform_indices = @transform_4, window_bounds = array<i64: 1, 128>}, {transform_indices = @transform_5, window_bounds = array<i64: 16, 128>}]} {
    %c0 = arith.constant 0 : index
    %c0_0 = arith.constant 0 : index
    %0 = vector.load %arg1[%c0, %c0_0] : memref<16x128xf32, #tpu.memory_space<vmem>>, vector<16x128xf32>
    %c0_1 = arith.constant 0 : index
    %c0_2 = arith.constant 0 : index
    %1 = vector.load %arg2[%c0_1, %c0_2] : memref<128x128xf32, #tpu.memory_space<vmem>>, vector<128x128xf32>
    %cst = arith.constant dense<0.000000e+00> : vector<16x128xf32>
    %2 = tpu.matmul %0, %1, %cst {dimension_numbers = #tpu.dot_dimension_numbers<[1], [1], [0], [0], [0, 0, 1, 0], [], []>} : vector<16x128xf32>, vector<128x128xf32>, vector<16x128xf32> -> vector<16x128xf32>
    %c0_3 = arith.constant 0 : index
    %c0_4 = arith.constant 0 : index
    %3 = vector.load %arg3[%c0_3, %c0_4] : memref<1x128xf32, #tpu.memory_space<vmem>>, vector<1x128xf32>
    %4 = vector.broadcast %3 : vector<1x128xf32> to vector<16x128xf32>
    %5 = arith.addf %2, %4 : vector<16x128xf32>
    %cst_5 = arith.constant 5.000000e-01 : f32
    %6 = vector.broadcast %cst_5 : f32 to vector<16x128xf32>
    %7 = arith.mulf %5, %6 : vector<16x128xf32>
    %cst_6 = arith.constant 0.707106769 : f32
    %8 = vector.broadcast %cst_6 : f32 to vector<16x128xf32>
    %9 = arith.mulf %5, %8 : vector<16x128xf32>
    %10 = math.erf %9 : vector<16x128xf32>
    %cst_7 = arith.constant 1.000000e+00 : f32
    %11 = vector.broadcast %cst_7 : f32 to vector<16x128xf32>
    %12 = arith.addf %11, %10 : vector<16x128xf32>
    %13 = arith.mulf %7, %12 : vector<16x128xf32>
    %cst_8 = arith.constant dense<0.000000e+00> : vector<16xf32>
    %14 = vector.multi_reduction <add>, %13, %cst_8 [1] : vector<16x128xf32> to vector<16xf32>
    %15 = vector.shape_cast %14 : vector<16xf32> to vector<16x1xf32>
    %16 = arith.mulf %13, %13 : vector<16x128xf32>
    %cst_9 = arith.constant dense<0.000000e+00> : vector<16xf32>
    %17 = vector.multi_reduction <add>, %16, %cst_9 [1] : vector<16x128xf32> to vector<16xf32>
    %18 = vector.shape_cast %17 : vector<16xf32> to vector<16x1xf32>
    %cst_10 = arith.constant 7.812500e-03 : f32
    %19 = vector.broadcast %cst_10 : f32 to vector<16x1xf32>
    %20 = arith.mulf %15, %19 : vector<16x1xf32>
    %cst_11 = arith.constant 7.812500e-03 : f32
    %21 = vector.broadcast %cst_11 : f32 to vector<16x1xf32>
    %22 = arith.mulf %18, %21 : vector<16x1xf32>
    %23 = arith.mulf %20, %20 : vector<16x1xf32>
    %24 = arith.subf %22, %23 : vector<16x1xf32>
    %cst_12 = arith.constant 0.000000e+00 : f32
    %25 = vector.broadcast %cst_12 : f32 to vector<16x1xf32>
    %26 = arith.maximumf %24, %25 : vector<16x1xf32>
    %cst_13 = arith.constant 9.99999996E-13 : f32
    %27 = vector.broadcast %cst_13 : f32 to vector<16x1xf32>
    %28 = arith.addf %26, %27 : vector<16x1xf32>
    %29 = math.rsqrt %28 : vector<16x1xf32>
    %30 = vector.broadcast %20 : vector<16x1xf32> to vector<16x128xf32>
    %31 = arith.subf %13, %30 : vector<16x128xf32>
    %32 = vector.broadcast %29 : vector<16x1xf32> to vector<16x128xf32>
    %33 = arith.mulf %31, %32 : vector<16x128xf32>
    %c0_14 = arith.constant 0 : index
    %c0_15 = arith.constant 0 : index
    %34 = vector.load %arg4[%c0_14, %c0_15] : memref<1x128xf32, #tpu.memory_space<vmem>>, vector<1x128xf32>
    %35 = vector.broadcast %34 : vector<1x128xf32> to vector<16x128xf32>
    %36 = arith.mulf %33, %35 : vector<16x128xf32>
    %c0_16 = arith.constant 0 : index
    %c0_17 = arith.constant 0 : index
    %37 = vector.load %arg5[%c0_16, %c0_17] : memref<1x128xf32, #tpu.memory_space<vmem>>, vector<1x128xf32>
    %38 = vector.broadcast %37 : vector<1x128xf32> to vector<16x128xf32>
    %39 = arith.addf %36, %38 : vector<16x128xf32>
    %c0_18 = arith.constant 0 : index
    %c0_19 = arith.constant 0 : index
    %40 = vector.load %arg6[%c0_18, %c0_19] : memref<16x128xf32, #tpu.memory_space<vmem>>, vector<16x128xf32>
    tpu.vector_store %arg6[%c0_18, %c0_19], %39 {strides = array<i32>} : memref<16x128xf32, #tpu.memory_space<vmem>>, vector<16x128xf32>,
    return
  }
  func.func @transform_0(%arg0: i32) -> (i32, i32) {
    %c0_i32 = arith.constant 0 : i32
    %c0_i32_0 = arith.constant 0 : i32
    return %arg0, %c0_i32 : i32, i32
  }
  func.func @transform_1(%arg0: i32) -> (i32, i32) {
    %c0_i32 = arith.constant 0 : i32
    %c0_i32_0 = arith.constant 0 : i32
    %c0_i32_1 = arith.constant 0 : i32
    return %c0_i32, %c0_i32_0 : i32, i32
  }
  func.func @transform_2(%arg0: i32) -> (i32, i32) {
    %c0_i32 = arith.constant 0 : i32
    %c0_i32_0 = arith.constant 0 : i32
    %c0_i32_1 = arith.constant 0 : i32
    return %c0_i32, %c0_i32_0 : i32, i32
  }
  func.func @transform_3(%arg0: i32) -> (i32, i32) {
    %c0_i32 = arith.constant 0 : i32
    %c0_i32_0 = arith.constant 0 : i32
    %c0_i32_1 = arith.constant 0 : i32
    return %c0_i32, %c0_i32_0 : i32, i32
  }
  func.func @transform_4(%arg0: i32) -> (i32, i32) {
    %c0_i32 = arith.constant 0 : i32
    %c0_i32_0 = arith.constant 0 : i32
    %c0_i32_1 = arith.constant 0 : i32
    return %c0_i32, %c0_i32_0 : i32, i32
  }
  func.func @transform_5(%arg0: i32) -> (i32, i32) {
    %c0_i32 = arith.constant 0 : i32
    %c0_i32_0 = arith.constant 0 : i32
    return %arg0, %c0_i32 : i32, i32
  }
}

module attributes {stable_mosaic.version = 11 : i64} {
  func.func @head_transform_kernel(%arg0: i32, %arg1: memref<16x128xf32, #tpu.memory_space<vmem>>, %arg2: memref<128x128xf32, #tpu.memory_space<vmem>>, %arg3: memref<1x128xf32, #tpu.memory_space<vmem>>, %arg4: memref<1x128xf32, #tpu.memory_space<vmem>>, %arg5: memref<1x128xf32, #tpu.memory_space<vmem>>, %arg6: memref<16x128xf32, #tpu.memory_space<vmem>>) attributes {dimension_semantics = [#tpu.dimension_semantics<parallel>], iteration_bounds = array<i64: 1>, scalar_prefetch = 0 : i64, scratch_operands = 0 : i64, tpu.core_type = #tpu.core_type<tc>, window_params = [{transform_indices = @transform_0, window_bounds = array<i64: 16, 128>}, {pipeline_mode = #tpu.pipeline_mode<synchronous>, transform_indices = @transform_1, window_bounds = array<i64: 128, 128>}, {pipeline_mode = #tpu.pipeline_mode<synchronous>, transform_indices = @transform_2, window_bounds = array<i64: 1, 128>}, {pipeline_mode = #tpu.pipeline_mode<synchronous>, transform_indices = @transform_3, window_bounds = array<i64: 1, 128>}, {pipeline_mode = #tpu.pipeline_mode<synchronous>, transform_indices = @transform_4, window_bounds = array<i64: 1, 128>}, {transform_indices = @transform_5, window_bounds = array<i64: 16, 128>}]} {
    %c0 = arith.constant 0 : index
    %c0_0 = arith.constant 0 : index
    %0 = vector.load %arg1[%c0, %c0_0] : memref<16x128xf32, #tpu.memory_space<vmem>>, vector<16x128xf32>
    %c0_1 = arith.constant 0 : index
    %c0_2 = arith.constant 0 : index
    %1 = vector.load %arg2[%c0_1, %c0_2] : memref<128x128xf32, #tpu.memory_space<vmem>>, vector<128x128xf32>
    %cst = arith.constant dense<0.000000e+00> : vector<16x128xf32>
    %2 = tpu.matmul %0, %1, %cst {dimension_numbers = #tpu.dot_dimension_numbers<[1], [1], [0], [0], [0, 0, 1, 0], [], []>} : vector<16x128xf32>, vector<128x128xf32>, vector<16x128xf32> -> vector<16x128xf32>
    %c0_3 = arith.constant 0 : index
    %c0_4 = arith.constant 0 : index
    %3 = vector.load %arg3[%c0_3, %c0_4] : memref<1x128xf32, #tpu.memory_space<vmem>>, vector<1x128xf32>
    %4 = vector.broadcast %3 : vector<1x128xf32> to vector<16x128xf32>
    %5 = arith.addf %2, %4 : vector<16x128xf32>
    %cst_5 = arith.constant 5.000000e-01 : f32
    %6 = vector.broadcast %cst_5 : f32 to vector<16x128xf32>
    %7 = arith.mulf %5, %6 : vector<16x128xf32>
    %cst_6 = arith.constant 0.707106769 : f32
    %8 = vector.broadcast %cst_6 : f32 to vector<16x128xf32>
    %9 = arith.mulf %5, %8 : vector<16x128xf32>
    %10 = math.erf %9 : vector<16x128xf32>
    %cst_7 = arith.constant 1.000000e+00 : f32
    %11 = vector.broadcast %cst_7 : f32 to vector<16x128xf32>
    %12 = arith.addf %11, %10 : vector<16x128xf32>
    %13 = arith.mulf %7, %12 : vector<16x128xf32>
    %cst_8 = arith.constant dense<0.000000e+00> : vector<16xf32>
    %14 = vector.multi_reduction <add>, %13, %cst_8 [1] : vector<16x128xf32> to vector<16xf32>
    %15 = vector.shape_cast %14 : vector<16xf32> to vector<16x1xf32>
    %16 = arith.mulf %13, %13 : vector<16x128xf32>
    %cst_9 = arith.constant dense<0.000000e+00> : vector<16xf32>
    %17 = vector.multi_reduction <add>, %16, %cst_9 [1] : vector<16x128xf32> to vector<16xf32>
    %18 = vector.shape_cast %17 : vector<16xf32> to vector<16x1xf32>
    %cst_10 = arith.constant 7.812500e-03 : f32
    %19 = vector.broadcast %cst_10 : f32 to vector<16x1xf32>
    %20 = arith.mulf %15, %19 : vector<16x1xf32>
    %cst_11 = arith.constant 7.812500e-03 : f32
    %21 = vector.broadcast %cst_11 : f32 to vector<16x1xf32>
    %22 = arith.mulf %18, %21 : vector<16x1xf32>
    %23 = arith.mulf %20, %20 : vector<16x1xf32>
    %24 = arith.subf %22, %23 : vector<16x1xf32>
    %cst_12 = arith.constant 0.000000e+00 : f32
    %25 = vector.broadcast %cst_12 : f32 to vector<16x1xf32>
    %26 = arith.maximumf %24, %25 : vector<16x1xf32>
    %cst_13 = arith.constant 9.99999996E-13 : f32
    %27 = vector.broadcast %cst_13 : f32 to vector<16x1xf32>
    %28 = arith.addf %26, %27 : vector<16x1xf32>
    %29 = math.rsqrt %28 : vector<16x1xf32>
    %30 = vector.broadcast %20 : vector<16x1xf32> to vector<16x128xf32>
    %31 = arith.subf %13, %30 : vector<16x128xf32>
    %32 = vector.broadcast %29 : vector<16x1xf32> to vector<16x128xf32>
    %33 = arith.mulf %31, %32 : vector<16x128xf32>
    %c0_14 = arith.constant 0 : index
    %c0_15 = arith.constant 0 : index
    %34 = vector.load %arg4[%c0_14, %c0_15] : memref<1x128xf32, #tpu.memory_space<vmem>>, vector<1x128xf32>
    %35 = vector.broadcast %34 : vector<1x128xf32> to vector<16x128xf32>
    %36 = arith.mulf %33, %35 : vector<16x128xf32>
    %c0_16 = arith.constant 0 : index
    %c0_17 = arith.constant 0 : index
    %37 = vector.load %arg5[%c0_16, %c0_17] : memref<1x128xf32, #tpu.memory_space<vmem>>, vector<1x128xf32>
    %38 = vector.broadcast %37 : vector<1x128xf32> to vector<16x128xf32>
    %39 = arith.addf %36, %38 : vector<16x128xf32>
    %c0_18 = arith.constant 0 : index
    %c0_19 = arith.constant 0 : index
    %40 = vector.load %arg6[%c0_18, %c0_19] : memref<16x128xf32, #tpu.memory_space<vmem>>, vector<16x128xf32>
    tpu.vector_store %arg6[%c0_18, %c0_19], %39 {strides = array<i32>} : memref<16x128xf32, #tpu.memory_space<vmem>>, vector<16x128xf32>,
    return
  }
  func.func @transform_0(%arg0: i32) -> (i32, i32) {
    %c0_i32 = arith.constant 0 : i32
    %c0_i32_0 = arith.constant 0 : i32
    return %arg0, %c0_i32 : i32, i32
  }
  func.func @transform_1(%arg0: i32) -> (i32, i32) {
    %c0_i32 = arith.constant 0 : i32
    %c0_i32_0 = arith.constant 0 : i32
    %c0_i32_1 = arith.constant 0 : i32
    return %c0_i32, %c0_i32_0 : i32, i32
  }
  func.func @transform_2(%arg0: i32) -> (i32, i32) {
    %c0_i32 = arith.constant 0 : i32
    %c0_i32_0 = arith.constant 0 : i32
    %c0_i32_1 = arith.constant 0 : i32
    return %c0_i32, %c0_i32_0 : i32, i32
  }
  func.func @transform_3(%arg0: i32) -> (i32, i32) {
    %c0_i32 = arith.constant 0 : i32
    %c0_i32_0 = arith.constant 0 : i32
    %c0_i32_1 = arith.constant 0 : i32
    return %c0_i32, %c0_i32_0 : i32, i32
  }
  func.func @transform_4(%arg0: i32) -> (i32, i32) {
    %c0_i32 = arith.constant 0 : i32
    %c0_i32_0 = arith.constant 0 : i32
    %c0_i32_1 = arith.constant 0 : i32
    return %c0_i32, %c0_i32_0 : i32, i32
  }
  func.func @transform_5(%arg0: i32) -> (i32, i32) {
    %c0_i32 = arith.constant 0 : i32
    %c0_i32_0 = arith.constant 0 : i32
    return %arg0, %c0_i32 : i32, i32
  }
}

</mosaic_0001>

<bundles_post_ra>
// kernel: tpu_custom_call.1
= control target key start
LH: loop header
LB: loop body
LE: loop exit
PB: predicated region body
PF: predicated region fallthrough
CT: control target
= control target key end

     0   :  { %10 = vsyncpa [#allocation3], 0  ;;  %s487_s0 = inlined_call_operand.hbm [shape: f32[16,128], index: 0, kind: input, shape index: {}]   ;;  %s488_s1 = inlined_call_operand.hbm [shape: f32[128,128], index: 1, kind: input, shape index: {}]   ;;  %s489_s2 = inlined_call_operand.vmem [shape: f32[1,128], index: 2, kind: input, shape index: {}]   ;;  %s490_s3 = inlined_call_operand.vmem [shape: f32[1,128], index: 3, kind: input, shape index: {}]   ;;  %s491_s4 = inlined_call_operand.vmem [shape: f32[1,128], index: 4, kind: input, shape index: {}]   ;;  %s492_s5 = inlined_call_operand.hbm [shape: f32[16,128], index: 5, kind: output, shape index: {}]  }
   0x1   :  { %11 = vsyncpa [#allocation6], 0 }
   0x2   :  { %12 = vsyncpa [#allocation4], 0  ;;  %s398_s18 = smov [#allocation2]   ;;  %s326_s22 = scalar_lea.hbm %s487_s0, 256 }
   0x3   :  { %s18_s19 = sshll.u32 %s398_s18, 4  ;;  %p327_p0 = scmp.ne.s32.totalorder %s487_s0, %s326_s22  ;;  %s19_s19 = int_to_ptr.vmem [resolvable:$true] %s18_s19 }
   0x4   :  { %p330_p1 = scmp.lt.u32.totalorder %s326_s22, %s487_s0 }
   0x6   :  { %p332_p2 = pnand %p330_p1, %p327_p0 }
   0x8   :  { %335 = shalt.err (!%p332_p2)
}
   0x9   :  { %s336_s27 = scalar_lea.vmem %s19_s19, 256  ;;  %p341_p4 = scmp.lt.s32.totalorder %s19_s19, %s19_s19 }
   0xa   :  { %p337_p3 = scmp.ne.s32.totalorder %s19_s19, %s336_s27  ;;  %p342_p5 = scmp.lt.s32.totalorder %s336_s27, %s336_s27 }
   0xc   :  { %p343_p6 = por %p342_p5, %p341_p4 }
   0xe   :  { %p344_p7 = pnand %p343_p6, %p337_p3 }
  0x10   :  { %347 = shalt.err (!%p344_p7)
}
  0x11   :  { %s399_s28 = smov 128   ;;  %s400_s29 = smov 8  }
  0x12   :  { %24 = dma.hbm_to_vmem [thread:$0]  %s487_s0, 256, %s19_s19, [#allocation3], %s399_s28, %s399_s28, %s400_s29  }
  0x13   :  { %s401_s7 = smov [#allocation5]   ;;  %s348_s11 = scalar_lea.hbm %s488_s1, 2048 }
  0x14   :  { %s30_s8 = sshll.u32 %s401_s7, 4  ;;  %p349_p8 = scmp.ne.s32.totalorder %s488_s1, %s348_s11  ;;  %s31_s8 = int_to_ptr.vmem [resolvable:$true] %s30_s8 }
  0x15   :  { %p352_p9 = scmp.lt.u32.totalorder %s348_s11, %s488_s1 }
  0x17   :  { %p354_p10 = pnand %p352_p9, %p349_p8 }
  0x19   :  { %357 = shalt.err (!%p354_p10)
}
  0x1a   :  { %s358_s16 = scalar_lea.vmem %s31_s8, 2048  ;;  %p363_p12 = scmp.lt.s32.totalorder %s31_s8, %s31_s8 }
  0x1b   :  { %p359_p11 = scmp.ne.s32.totalorder %s31_s8, %s358_s16  ;;  %p364_p13 = scmp.lt.s32.totalorder %s358_s16, %s358_s16 }
  0x1d   :  { %p365_p0 = por %p364_p13, %p363_p12 }
  0x1f   :  { %p366_p1 = pnand %p365_p0, %p359_p11 }
  0x21   :  { %369 = shalt.err (!%p366_p1)
}
  0x22   :  { %36 = dma.hbm_to_vmem [thread:$0]  %s488_s1, 2048, %s31_s8, [#allocation6], %s399_s28, %s399_s28, %s400_s29  }
  0x23   :  { %392 = dma.done.wait [#allocation3], 256  }
  0x24   :  { %393 = vsyncadd [#allocation3], 4294967040 }
  0x25   :  { %394 = dma.done.wait [#allocation6], 2048  }
  0x26   :  { %395 = vsyncadd [#allocation6], 4294965248  ;;  %v51_v0 = vld [vmem:[#allocation5] sm:$0xff]  ;;  %v52_v1 = vld [vmem:[#allocation5 + $0x8] sm:$0xff]  ;;  %s402_s22 = smov [#allocation7]  }
  0x27   :  { %v53_v2 = vld [vmem:[#allocation5 + $0x10] sm:$0xff]  ;;  %v281_v3 = vpack.c.bf16 %v52_v1, %v51_v0  ;;  %v54_v4 = vld [vmem:[#allocation5 + $0x18] sm:$0xff]  ;;  %v55_v7 = vld [vmem:[#allocation5 + $0x20] sm:$0xff]  ;;  %s212_s23 = sshll.u32 %s402_s22, 4  ;;  %s213_s23 = int_to_ptr.vmem [resolvable:$true] %s212_s23 }
  0x28   :  { %v285_v5 = vpack.c.bf16 %v54_v4, %v53_v2  ;;  %v49_v6 = vld [vmem:[#allocation2] sm:$0xff]  ;;  %v56_v8 = vld [vmem:[#allocation5 + $0x28] sm:$0xff]  ;;  %v58_v11 = vld [vmem:[#allocation5 + $0x38] sm:$0xff]  ;;  %s370_s24 = scalar_lea.vmem %s213_s23, 256  ;;  %p375_p3 = scmp.lt.s32.totalorder %s213_s23, %s213_s23 }
  0x29   :  { %282 = vmatprep.subr.bf16.mxu0 %v281_v3  ;;  %278 = vmatprep.mubr.f32.mxu0 %v49_v6  ;;  %v289_v9 = vpack.c.bf16 %v56_v8, %v55_v7  ;;  %v57_v10 = vld [vmem:[#allocation5 + $0x30] sm:$0xff]  ;;  %v59_v13 = vld [vmem:[#allocation5 + $0x40] sm:$0xff]  ;;  %v60_v14 = vld [vmem:[#allocation5 + $0x48] sm:$0xff]  ;;  %p371_p2 = scmp.ne.s32.totalorder %s213_s23, %s370_s24  ;;  %p376_p4 = scmp.lt.s32.totalorder %s370_s24, %s370_s24 }
  0x2a   :  { %284 = vmatpush3.bf16.xpose.msra.mxu0 %v281_v3  ;;  %v293_v12 = vpack.c.bf16 %v58_v11, %v57_v10  ;;  %v297_v15 = vpack.c.bf16 %v60_v14, %v59_v13  ;;  %v61_v16 = vld [vmem:[#allocation5 + $0x50] sm:$0xff]  ;;  %v62_v17 = vld [vmem:[#allocation5 + $0x58] sm:$0xff]  ;;  %v63_v19 = vld [vmem:[#allocation5 + $0x60] sm:$0xff] }
  0x2b   :  { %286 = vmatprep.subr.bf16.mxu0 %v285_v5  ;;  %v301_v18 = vpack.c.bf16 %v62_v17, %v61_v16  ;;  %v64_v20 = vld [vmem:[#allocation5 + $0x68] sm:$0xff]  ;;  %v65_v22 = vld [vmem:[#allocation5 + $0x70] sm:$0xff]  ;;  %v66_v23 = vld [vmem:[#allocation5 + $0x78] sm:$0xff]  ;;  %p377_p5 = por %p376_p4, %p375_p3 }
  0x2c   :  { %v305_v21 = vpack.c.bf16 %v64_v20, %v63_v19  ;;  %v309_v24 = vpack.c.bf16 %v66_v23, %v65_v22  ;;  %v50_v25 = vld [vmem:[#allocation2 + $0x8] sm:$0xff]  ;;  %v225_v26 = vld [vmem:[%s489_s2] ss:$0 sm:$0xff] }
  0x2d   :  { %v226_v61 = vld [vmem:[%s490_s3] ss:$0 sm:$0xff]  ;;  %p378_p6 = pnand %p377_p5, %p371_p2 }
  0x2e   :  { %v227_v63 = vld [vmem:[%s491_s4] ss:$0 sm:$0xff] }
  0x32   :  { %288 = vmatpush3.bf16.xpose.msra.mxu0 %v285_v5 }
  0x33   :  { %290 = vmatprep.subr.bf16.mxu0 %v289_v9 }
  0x3a   :  { %292 = vmatpush3.bf16.xpose.msra.mxu0 %v289_v9 }
  0x3b   :  { %294 = vmatprep.subr.bf16.mxu0 %v293_v12 }
  0x42   :  { %296 = vmatpush3.bf16.xpose.msra.mxu0 %v293_v12 }
  0x43   :  { %298 = vmatprep.subr.bf16.mxu0 %v297_v15 }
  0x4a   :  { %300 = vmatpush3.bf16.xpose.msra.mxu0 %v297_v15 }
  0x4b   :  { %302 = vmatprep.subr.bf16.mxu0 %v301_v18 }
  0x52   :  { %304 = vmatpush3.bf16.xpose.msra.mxu0 %v301_v18 }
  0x53   :  { %306 = vmatprep.subr.bf16.mxu0 %v305_v21 }
  0x5a   :  { %308 = vmatpush3.bf16.xpose.msra.mxu0 %v305_v21 }
  0x5b   :  { %310 = vmatprep.subr.bf16.mxu0 %v309_v24 }
  0x62   :  { %312 = vmatpush3.bf16.xpose.msra.mxu0 %v309_v24 }
  0x69   :  { %279 = vmatmul.mubr.f32.vlgmr.msra.gmra.mrb[0].mxu0 %v50_v25 }
 0x13c   :  { %v280_v27 = vpop.f32.mrb[0].mxu0 }
 0x13d   :  { %v146_v28 = vadd.f32 %v280_v27, %v225_v26  ;;  %v140_v29 = vpop.f32.mrb[1].mxu0 }
 0x13e   :  { %v141_v30 = vadd.f32 %v225_v26, %v140_v29 }
 0x13f   :  { %v152_v31 = vmul.f32 0.70710677, %v146_v28  ;;  %v150_v38 = vmul.f32 0.5, %v146_v28 }
 0x140   :  { %v151_v32 = vmul.f32 0.70710677, %v141_v30  ;;  %v149_v36 = vmul.f32 0.5, %v141_v30 }
 0x141   :  { %318 = verf.f32 %v152_v31 }
 0x142   :  { %320 = verf.f32 %v151_v32 }
 0x14b   :  { %v319_v33 = vpop.eup %318 }
 0x14c   :  { %v321_v34 = vpop.eup %320  ;;  %v156_v35 = vadd.f32 1.0, %v319_v33 }
 0x14d   :  { %v155_v37 = vadd.f32 1.0, %v321_v34 }
 0x14e   :  { %v158_v41 = vmul.f32 %v156_v35, %v150_v38 }
 0x14f   :  { %v157_v39 = vmul.f32 %v155_v37, %v149_v36 }
 0x150   :  { %v164_v42 = vmul.f32 %v158_v41, %v158_v41 }
 0x151   :  { %159 = vadd.xlane.f32.xlu0 %v157_v39  ;;  %v163_v40 = vmul.f32 %v157_v39, %v157_v39 }
 0x153   :  { %165 = vadd.xlane.f32.xlu1 %v163_v40 }
 0x155   :  { %161 = vadd.xlane.f32.xlu0 %v158_v41 }
 0x157   :  { %167 = vadd.xlane.f32.xlu1 %v164_v42 }
 0x1de   :  { %v160_v43 = vpop.xlane.xlu0 %159 }
 0x1df   :  { %v169_v44 = vmul.f32 0.0078125, %v160_v43 }
 0x1e0   :  { %v166_v45 = vpop.xlane.xlu1 %165 }
 0x1e1   :  { %v173_v46 = vmul.f32 %v169_v44, %v169_v44  ;;  %v171_v47 = vmul.f32 0.0078125, %v166_v45  ;;  %v183_v59 = vsub.f32 %v157_v39, %v169_v44 }
 0x1e2   :  { %v162_v48 = vpop.xlane.xlu0 %161 }
 0x1e3   :  { %v175_v49 = vsub.f32 %v171_v47, %v173_v46  ;;  %v170_v50 = vmul.f32 0.0078125, %v162_v48 }
 0x1e4   :  { %v168_v51 = vpop.xlane.xlu1 %167 }
 0x1e5   :  { %v177_v52 = vmax.f32 %v175_v49, 0.0  ;;  %v174_v53 = vmul.f32 %v170_v50, %v170_v50  ;;  %v172_v54 = vmul.f32 0.0078125, %v168_v51  ;;  %v184_v0 = vsub.f32 %v158_v41, %v170_v50 }
 0x1e7   :  { %v179_v55 = vadd.f32 1e-12, %v177_v52  ;;  %v176_v56 = vsub.f32 %v172_v54, %v174_v53 }
 0x1e9   :  { %322 = vrsqrt.f32 %v179_v55  ;;  %v178_v57 = vmax.f32 %v176_v56, 0.0 }
 0x1eb   :  { %v180_v58 = vadd.f32 1e-12, %v178_v57 }
 0x1ed   :  { %324 = vrsqrt.f32 %v180_v58 }
 0x1f3   :  { %v323_v60 = vpop.eup %322 }
 0x1f4   :  { %v185_v62 = vmul.f32 %v323_v60, %v183_v59 }
 0x1f6   :  { %v194_v1 = vmul.f32 %v226_v61, %v185_v62 }
 0x1f7   :  { %v325_v2 = vpop.eup %324 }
 0x1f8   :  { %v186_v3 = vmul.f32 %v325_v2, %v184_v0  ;;  %v203_v4 = vadd.f32 %v227_v63, %v194_v1 }
 0x1fa   :  { %v195_v5 = vmul.f32 %v226_v61, %v186_v3  ;;  %205 = vst [vmem:[#allocation7] sm:$0xff] %v203_v4 }
 0x1fc   :  { %v204_v6 = vadd.f32 %v227_v63, %v195_v5 }
 0x1fe   :  { %206 = vst [vmem:[#allocation7 + $0x8] sm:$0xff] %v204_v6 }
 0x1ff   :  { %381 = shalt.err (!%p378_p6)
}
 0x200   :  { %s382_s25 = scalar_lea.hbm %s492_s5, 256 }
 0x201   :  { %p383_p7 = scmp.ne.s32.totalorder %s492_s5, %s382_s25  ;;  %p386_p8 = scmp.lt.u32.totalorder %s382_s25, %s492_s5 }
 0x203   :  { %p388_p9 = pnand %p386_p8, %p383_p7 }
 0x205   :  { %391 = shalt.err (!%p388_p9)
}
 0x206   :  { %218 = dma.vmem_to_hbm [thread:$0]  %s213_s23, 256, %s492_s5, [#allocation4], %s399_s28, %s399_s28, %s400_s29  }
 0x207   :  { %396 = dma.done.wait [#allocation4], 256  }
 0x208   :  { %397 = vsyncadd [#allocation4], 4294967040 }
 0x209   :  { %222 = vsyncpa [#allocation3], 1 }
 0x20a   :  { %223 = vsyncpa [#allocation6], 1 }
 0x20b   :  { %224 = vsyncpa [#allocation4], 1 }

// kernel: tpu_custom_call.1
= control target key start
LH: loop header
LB: loop body
LE: loop exit
PB: predicated region body
PF: predicated region fallthrough
CT: control target
= control target key end

     0   :  { %10 = vsyncpa [#allocation3], 0  ;;  %s487_s0 = inlined_call_operand.hbm [shape: f32[16,128], index: 0, kind: input, shape index: {}]   ;;  %s488_s1 = inlined_call_operand.hbm [shape: f32[128,128], index: 1, kind: input, shape index: {}]   ;;  %s489_s2 = inlined_call_operand.vmem [shape: f32[1,128], index: 2, kind: input, shape index: {}]   ;;  %s490_s3 = inlined_call_operand.vmem [shape: f32[1,128], index: 3, kind: input, shape index: {}]   ;;  %s491_s4 = inlined_call_operand.vmem [shape: f32[1,128], index: 4, kind: input, shape index: {}]   ;;  %s492_s5 = inlined_call_operand.hbm [shape: f32[16,128], index: 5, kind: output, shape index: {}]  }
   0x1   :  { %11 = vsyncpa [#allocation6], 0 }
   0x2   :  { %12 = vsyncpa [#allocation4], 0  ;;  %s398_s18 = smov [#allocation2]   ;;  %s326_s22 = scalar_lea.hbm %s487_s0, 256 }
   0x3   :  { %s18_s19 = sshll.u32 %s398_s18, 4  ;;  %p327_p0 = scmp.ne.s32.totalorder %s487_s0, %s326_s22  ;;  %s19_s19 = int_to_ptr.vmem [resolvable:$true] %s18_s19 }
   0x4   :  { %p330_p1 = scmp.lt.u32.totalorder %s326_s22, %s487_s0 }
   0x6   :  { %p332_p2 = pnand %p330_p1, %p327_p0 }
   0x8   :  { %335 = shalt.err (!%p332_p2)
}
   0x9   :  { %s336_s27 = scalar_lea.vmem %s19_s19, 256  ;;  %p341_p4 = scmp.lt.s32.totalorder %s19_s19, %s19_s19 }
   0xa   :  { %p337_p3 = scmp.ne.s32.totalorder %s19_s19, %s336_s27  ;;  %p342_p5 = scmp.lt.s32.totalorder %s336_s27, %s336_s27 }
   0xc   :  { %p343_p6 = por %p342_p5, %p341_p4 }
   0xe   :  { %p344_p7 = pnand %p343_p6, %p337_p3 }
  0x10   :  { %347 = shalt.err (!%p344_p7)
}
  0x11   :  { %s399_s28 = smov 128   ;;  %s400_s29 = smov 8  }
  0x12   :  { %24 = dma.hbm_to_vmem [thread:$0]  %s487_s0, 256, %s19_s19, [#allocation3], %s399_s28, %s399_s28, %s400_s29  }
  0x13   :  { %s401_s7 = smov [#allocation5]   ;;  %s348_s11 = scalar_lea.hbm %s488_s1, 2048 }
  0x14   :  { %s30_s8 = sshll.u32 %s401_s7, 4  ;;  %p349_p8 = scmp.ne.s32.totalorder %s488_s1, %s348_s11  ;;  %s31_s8 = int_to_ptr.vmem [resolvable:$true] %s30_s8 }
  0x15   :  { %p352_p9 = scmp.lt.u32.totalorder %s348_s11, %s488_s1 }
  0x17   :  { %p354_p10 = pnand %p352_p9, %p349_p8 }
  0x19   :  { %357 = shalt.err (!%p354_p10)
}
  0x1a   :  { %s358_s16 = scalar_lea.vmem %s31_s8, 2048  ;;  %p363_p12 = scmp.lt.s32.totalorder %s31_s8, %s31_s8 }
  0x1b   :  { %p359_p11 = scmp.ne.s32.totalorder %s31_s8, %s358_s16  ;;  %p364_p13 = scmp.lt.s32.totalorder %s358_s16, %s358_s16 }
  0x1d   :  { %p365_p0 = por %p364_p13, %p363_p12 }
  0x1f   :  { %p366_p1 = pnand %p365_p0, %p359_p11 }
  0x21   :  { %369 = shalt.err (!%p366_p1)
}
  0x22   :  { %36 = dma.hbm_to_vmem [thread:$0]  %s488_s1, 2048, %s31_s8, [#allocation6], %s399_s28, %s399_s28, %s400_s29  }
  0x23   :  { %392 = dma.done.wait [#allocation3], 256  }
  0x24   :  { %393 = vsyncadd [#allocation3], 4294967040 }
  0x25   :  { %394 = dma.done.wait [#allocation6], 2048  }
  0x26   :  { %395 = vsyncadd [#allocation6], 4294965248  ;;  %v51_v0 = vld [vmem:[#allocation5] sm:$0xff]  ;;  %v52_v1 = vld [vmem:[#allocation5 + $0x8] sm:$0xff]  ;;  %s402_s22 = smov [#allocation7]  }
  0x27   :  { %v53_v2 = vld [vmem:[#allocation5 + $0x10] sm:$0xff]  ;;  %v281_v3 = vpack.c.bf16 %v52_v1, %v51_v0  ;;  %v54_v4 = vld [vmem:[#allocation5 + $0x18] sm:$0xff]  ;;  %v55_v7 = vld [vmem:[#allocation5 + $0x20] sm:$0xff]  ;;  %s212_s23 = sshll.u32 %s402_s22, 4  ;;  %s213_s23 = int_to_ptr.vmem [resolvable:$true] %s212_s23 }
  0x28   :  { %v285_v5 = vpack.c.bf16 %v54_v4, %v53_v2  ;;  %v49_v6 = vld [vmem:[#allocation2] sm:$0xff]  ;;  %v56_v8 = vld [vmem:[#allocation5 + $0x28] sm:$0xff]  ;;  %v58_v11 = vld [vmem:[#allocation5 + $0x38] sm:$0xff]  ;;  %s370_s24 = scalar_lea.vmem %s213_s23, 256  ;;  %p375_p3 = scmp.lt.s32.totalorder %s213_s23, %s213_s23 }
  0x29   :  { %282 = vmatprep.subr.bf16.mxu0 %v281_v3  ;;  %278 = vmatprep.mubr.f32.mxu0 %v49_v6  ;;  %v289_v9 = vpack.c.bf16 %v56_v8, %v55_v7  ;;  %v57_v10 = vld [vmem:[#allocation5 + $0x30] sm:$0xff]  ;;  %v59_v13 = vld [vmem:[#allocation5 + $0x40] sm:$0xff]  ;;  %v60_v14 = vld [vmem:[#allocation5 + $0x48] sm:$0xff]  ;;  %p371_p2 = scmp.ne.s32.totalorder %s213_s23, %s370_s24  ;;  %p376_p4 = scmp.lt.s32.totalorder %s370_s24, %s370_s24 }
  0x2a   :  { %284 = vmatpush3.bf16.xpose.msra.mxu0 %v281_v3  ;;  %v293_v12 = vpack.c.bf16 %v58_v11, %v57_v10  ;;  %v297_v15 = vpack.c.bf16 %v60_v14, %v59_v13  ;;  %v61_v16 = vld [vmem:[#allocation5 + $0x50] sm:$0xff]  ;;  %v62_v17 = vld [vmem:[#allocation5 + $0x58] sm:$0xff]  ;;  %v63_v19 = vld [vmem:[#allocation5 + $0x60] sm:$0xff] }
  0x2b   :  { %286 = vmatprep.subr.bf16.mxu0 %v285_v5  ;;  %v301_v18 = vpack.c.bf16 %v62_v17, %v61_v16  ;;  %v64_v20 = vld [vmem:[#allocation5 + $0x68] sm:$0xff]  ;;  %v65_v22 = vld [vmem:[#allocation5 + $0x70] sm:$0xff]  ;;  %v66_v23 = vld [vmem:[#allocation5 + $0x78] sm:$0xff]  ;;  %p377_p5 = por %p376_p4, %p375_p3 }
  0x2c   :  { %v305_v21 = vpack.c.bf16 %v64_v20, %v63_v19  ;;  %v309_v24 = vpack.c.bf16 %v66_v23, %v65_v22  ;;  %v50_v25 = vld [vmem:[#allocation2 + $0x8] sm:$0xff]  ;;  %v225_v26 = vld [vmem:[%s489_s2] ss:$0 sm:$0xff] }
  0x2d   :  { %v226_v61 = vld [vmem:[%s490_s3] ss:$0 sm:$0xff]  ;;  %p378_p6 = pnand %p377_p5, %p371_p2 }
  0x2e   :  { %v227_v63 = vld [vmem:[%s491_s4] ss:$0 sm:$0xff] }
  0x32   :  { %288 = vmatpush3.bf16.xpose.msra.mxu0 %v285_v5 }
  0x33   :  { %290 = vmatprep.subr.bf16.mxu0 %v289_v9 }
  0x3a   :  { %292 = vmatpush3.bf16.xpose.msra.mxu0 %v289_v9 }
  0x3b   :  { %294 = vmatprep.subr.bf16.mxu0 %v293_v12 }
  0x42   :  { %296 = vmatpush3.bf16.xpose.msra.mxu0 %v293_v12 }
  0x43   :  { %298 = vmatprep.subr.bf16.mxu0 %v297_v15 }
  0x4a   :  { %300 = vmatpush3.bf16.xpose.msra.mxu0 %v297_v15 }
  0x4b   :  { %302 = vmatprep.subr.bf16.mxu0 %v301_v18 }
  0x52   :  { %304 = vmatpush3.bf16.xpose.msra.mxu0 %v301_v18 }
  0x53   :  { %306 = vmatprep.subr.bf16.mxu0 %v305_v21 }
  0x5a   :  { %308 = vmatpush3.bf16.xpose.msra.mxu0 %v305_v21 }
  0x5b   :  { %310 = vmatprep.subr.bf16.mxu0 %v309_v24 }
  0x62   :  { %312 = vmatpush3.bf16.xpose.msra.mxu0 %v309_v24 }
  0x69   :  { %279 = vmatmul.mubr.f32.vlgmr.msra.gmra.mrb[0].mxu0 %v50_v25 }
 0x13c   :  { %v280_v27 = vpop.f32.mrb[0].mxu0 }
 0x13d   :  { %v146_v28 = vadd.f32 %v280_v27, %v225_v26  ;;  %v140_v29 = vpop.f32.mrb[1].mxu0 }
 0x13e   :  { %v141_v30 = vadd.f32 %v225_v26, %v140_v29 }
 0x13f   :  { %v152_v31 = vmul.f32 0.70710677, %v146_v28  ;;  %v150_v38 = vmul.f32 0.5, %v146_v28 }
 0x140   :  { %v151_v32 = vmul.f32 0.70710677, %v141_v30  ;;  %v149_v36 = vmul.f32 0.5, %v141_v30 }
 0x141   :  { %318 = verf.f32 %v152_v31 }
 0x142   :  { %320 = verf.f32 %v151_v32 }
 0x14b   :  { %v319_v33 = vpop.eup %318 }
 0x14c   :  { %v321_v34 = vpop.eup %320  ;;  %v156_v35 = vadd.f32 1.0, %v319_v33 }
 0x14d   :  { %v155_v37 = vadd.f32 1.0, %v321_v34 }
 0x14e   :  { %v158_v41 = vmul.f32 %v156_v35, %v150_v38 }
 0x14f   :  { %v157_v39 = vmul.f32 %v155_v37, %v149_v36 }
 0x150   :  { %v164_v42 = vmul.f32 %v158_v41, %v158_v41 }
 0x151   :  { %159 = vadd.xlane.f32.xlu0 %v157_v39  ;;  %v163_v40 = vmul.f32 %v157_v39, %v157_v39 }
 0x153   :  { %165 = vadd.xlane.f32.xlu1 %v163_v40 }
 0x155   :  { %161 = vadd.xlane.f32.xlu0 %v158_v41 }
 0x157   :  { %167 = vadd.xlane.f32.xlu1 %v164_v42 }
 0x1de   :  { %v160_v43 = vpop.xlane.xlu0 %159 }
 0x1df   :  { %v169_v44 = vmul.f32 0.0078125, %v160_v43 }
 0x1e0   :  { %v166_v45 = vpop.xlane.xlu1 %165 }
 0x1e1   :  { %v173_v46 = vmul.f32 %v169_v44, %v169_v44  ;;  %v171_v47 = vmul.f32 0.0078125, %v166_v45  ;;  %v183_v59 = vsub.f32 %v157_v39, %v169_v44 }
 0x1e2   :  { %v162_v48 = vpop.xlane.xlu0 %161 }
 0x1e3   :  { %v175_v49 = vsub.f32 %v171_v47, %v173_v46  ;;  %v170_v50 = vmul.f32 0.0078125, %v162_v48 }
 0x1e4   :  { %v168_v51 = vpop.xlane.xlu1 %167 }
 0x1e5   :  { %v177_v52 = vmax.f32 %v175_v49, 0.0  ;;  %v174_v53 = vmul.f32 %v170_v50, %v170_v50  ;;  %v172_v54 = vmul.f32 0.0078125, %v168_v51  ;;  %v184_v0 = vsub.f32 %v158_v41, %v170_v50 }
 0x1e7   :  { %v179_v55 = vadd.f32 1e-12, %v177_v52  ;;  %v176_v56 = vsub.f32 %v172_v54, %v174_v53 }
 0x1e9   :  { %322 = vrsqrt.f32 %v179_v55  ;;  %v178_v57 = vmax.f32 %v176_v56, 0.0 }
 0x1eb   :  { %v180_v58 = vadd.f32 1e-12, %v178_v57 }
 0x1ed   :  { %324 = vrsqrt.f32 %v180_v58 }
 0x1f3   :  { %v323_v60 = vpop.eup %322 }
 0x1f4   :  { %v185_v62 = vmul.f32 %v323_v60, %v183_v59 }
 0x1f6   :  { %v194_v1 = vmul.f32 %v226_v61, %v185_v62 }
 0x1f7   :  { %v325_v2 = vpop.eup %324 }
 0x1f8   :  { %v186_v3 = vmul.f32 %v325_v2, %v184_v0  ;;  %v203_v4 = vadd.f32 %v227_v63, %v194_v1 }
 0x1fa   :  { %v195_v5 = vmul.f32 %v226_v61, %v186_v3  ;;  %205 = vst [vmem:[#allocation7] sm:$0xff] %v203_v4 }
 0x1fc   :  { %v204_v6 = vadd.f32 %v227_v63, %v195_v5 }
 0x1fe   :  { %206 = vst [vmem:[#allocation7 + $0x8] sm:$0xff] %v204_v6 }
 0x1ff   :  { %381 = shalt.err (!%p378_p6)
}
 0x200   :  { %s382_s25 = scalar_lea.hbm %s492_s5, 256 }
 0x201   :  { %p383_p7 = scmp.ne.s32.totalorder %s492_s5, %s382_s25  ;;  %p386_p8 = scmp.lt.u32.totalorder %s382_s25, %s492_s5 }
 0x203   :  { %p388_p9 = pnand %p386_p8, %p383_p7 }
 0x205   :  { %391 = shalt.err (!%p388_p9)
}
 0x206   :  { %218 = dma.vmem_to_hbm [thread:$0]  %s213_s23, 256, %s492_s5, [#allocation4], %s399_s28, %s399_s28, %s400_s29  }
 0x207   :  { %396 = dma.done.wait [#allocation4], 256  }
 0x208   :  { %397 = vsyncadd [#allocation4], 4294967040 }
 0x209   :  { %222 = vsyncpa [#allocation3], 1 }
 0x20a   :  { %223 = vsyncpa [#allocation6], 1 }
 0x20b   :  { %224 = vsyncpa [#allocation4], 1 }

</bundles_post_ra>
